<compile_context>
chip_gen: v5e
topology: v5e:2x2
jax: 0.10.0
libtpu: 0.0.40
codegen_flags: <defaults>
</compile_context>

<pallas_src>
import jax
import jax.numpy as jnp
from jax.experimental import pallas as pl
from jax.experimental.pallas import tpu as pltpu

_MIB = 1024 * 1024
_MIN_KERNEL_BYTES = 1 * _MIB      # below this a kernel call is pure overhead
_MIN_TWO_STEP_BYTES = 1 * _MIB    # above this, force >= 2 grid steps (megacore)


def _identity_kernel(x_ref, o_ref):
    # Pure element-wise passthrough of the current tile.
    o_ref[...] = x_ref[...]


def _sublane_multiple(itemsize: int) -> int:
    """Sub-32-bit dtypes pack along sublanes: f32 -> 8, bf16 -> 16, u8 -> 32."""
    return 8 * max(1, 4 // itemsize)


def _tile_budget_bytes() -> int:
    """Per-tile byte budget, generation-aware.

    4 MiB tiles x ~4 live buffers (in+out double-buffered) ~= 16 MiB, which is
    comfortable under the v6e/v7x 32 MiB scoped-VMEM default.  v5e's 16 MiB
    scoped default wants smaller tiles (2 MiB x 4 = 8 MiB).
    """
    try:
        kind = jax.devices()[0].device_kind.lower()
    except Exception:  # pragma: no cover - defensive; fall back to safe budget
        kind = ""
    if "v5 lite" in kind or "v5lite" in kind or "v5e" in kind:
        return 2 * _MIB
    return 4 * _MIB


def _choose_lane_dense_layout(total: int, sublane_mult: int):
    """Pick (rows, cols) with cols a large multiple of 128 (lane-dense).

    Prefer rows aligned to the dtype's sublane packing multiple.
    """
    candidates = (1024, 512, 256, 128)
    for cols in candidates:
        if total % cols == 0 and (total // cols) % sublane_mult == 0:
            return total // cols, cols
    for cols in candidates:
        if total % cols == 0:
            return total // cols, cols
    return None


def _choose_tile_rows(rows: int, cols: int, itemsize: int,
                      sublane_mult: int, budget_bytes: int) -> int:
    """Largest sublane-aligned tile_rows under the byte budget.

    No divisibility requirement: grid = cdiv(rows, tile_rows) and Pallas masks
    the ragged final block.  For arrays > ~1 MiB the tile is capped so the grid
    has >= 2 steps (lets the "parallel" axis shard across v7x's 2 TensorCores).
    """
    row_bytes = cols * itemsize
    tr = min(rows, max(1, budget_bytes // row_bytes))
    tr -= tr % sublane_mult
    if tr < sublane_mult:
        # Tiny array: a single full-extent block is always legal.
        return rows
    total_bytes = rows * row_bytes
    if total_bytes > _MIN_TWO_STEP_BYTES and tr >= rows:
        half = rows // 2
        tr = max(sublane_mult, half - (half % sublane_mult))
    return tr


def _no_shift_aug_pallas(x: jax.Array, *, alias_input: bool = False,
                         min_kernel_bytes: int = _MIN_KERNEL_BYTES) -> jax.Array:
    """Identity via an explicitly tiled Pallas copy kernel."""
    total = int(x.size)
    if total == 0:
        return x
    itemsize = jnp.dtype(x.dtype).itemsize
    nbytes = total * itemsize

    # Size guard: a kernel call for a tiny copy is pure dispatch overhead.
    if nbytes < min_kernel_bytes and not alias_input:
        return x

    sublane_mult = _sublane_multiple(itemsize)
    layout = _choose_lane_dense_layout(total, sublane_mult)
    if layout is None:
        # Cannot form a lane-dense 2D view; identity is exact without a kernel.
        return x
    rows, cols = layout

    tile_rows = _choose_tile_rows(rows, cols, itemsize, sublane_mult,
                                  _tile_budget_bytes())
    grid = (pl.cdiv(rows, tile_rows),)
    tile_bytes = tile_rows * cols * itemsize
    # In + out, double-buffered, plus headroom.
    vmem_limit = int(min(128 * _MIB, 4 * tile_bytes + 4 * _MIB))

    x2d = x.reshape(rows, cols)  # layout glue only

    call_kwargs = dict(
        out_shape=jax.ShapeDtypeStruct((rows, cols), x2d.dtype),
        grid_spec=pltpu.PrefetchScalarGridSpec(
            num_scalar_prefetch=0,
            grid=grid,
            in_specs=[pl.BlockSpec((tile_rows, cols), lambda i: (i, 0))],
            out_specs=pl.BlockSpec((tile_rows, cols), lambda i: (i, 0)),
        ),
        compiler_params=pltpu.CompilerParams(
            dimension_semantics=("parallel",),
            vmem_limit_bytes=vmem_limit,
        ),
        # Pure bandwidth: zero FLOPs, one read + one write of the array.
        cost_estimate=pl.CostEstimate(flops=0, transcendentals=0,
                                      bytes_accessed=2 * nbytes),
    )
    if alias_input:
        # Only alias when the caller actually donates x (under jit); otherwise
        # XLA inserts a defensive copy and total HBM traffic goes UP.
        call_kwargs["input_output_aliases"] = {0: 0}

    out2d = pl.pallas_call(_identity_kernel, **call_kwargs)(x2d)
    return out2d.reshape(x.shape)


def no_shift_aug(x: jax.Array, *, force_kernel: bool = False,
                 donate_input: bool = False,
                 min_kernel_bytes: int = _MIN_KERNEL_BYTES) -> jax.Array:
    """NoShiftAug.forward: identity.

    Default (recommended) path is a zero-cost `return x`.  Set
    force_kernel=True only when an explicit kernel boundary is required, and
    donate_input=True only when x is actually donated under jit.
    """
    if not force_kernel:
        return x
    return _no_shift_aug_pallas(x, alias_input=donate_input,
                                min_kernel_bytes=min_kernel_bytes)


if __name__ == "__main__":
    key = jax.random.PRNGKey(0)
    # Small NCHW input consistent with an image-augmentation module.
    x = jax.random.normal(key, (2, 4, 16, 16), dtype=jnp.float32)

    # Recommended hot path: pure identity, zero cost.
    y_fast = no_shift_aug(x)
    assert y_fast is x

    # Kernel path (min_kernel_bytes=0 to exercise Pallas even at this size).
    y = no_shift_aug(x, force_kernel=True, min_kernel_bytes=0)
    jax.block_until_ready(y)
    assert y.shape == x.shape
    assert y.dtype == x.dtype
    assert bool(jnp.all(y == x))

    # Packed-dtype path (uint8 pixel-style observations): exercises the
    # dtype-aware sublane alignment (multiple of 32 for 1-byte dtypes).
    xu8 = jax.random.randint(jax.random.PRNGKey(1), (2, 4, 32, 32), 0, 256,
                             dtype=jnp.int32).astype(jnp.uint8)
    yu8 = no_shift_aug(xu8, force_kernel=True, min_kernel_bytes=0)
    jax.block_until_ready(yu8)
    assert yu8.shape == xu8.shape
    assert yu8.dtype == xu8.dtype
    assert bool(jnp.all(yu8 == xu8))

    print("KERNEL_OK")
</pallas_src>

<mosaic_0001>
module attributes {stable_mosaic.version = 11 : i64} {
  func.func @_identity_kernel(%arg0: i32, %arg1: memref<8x256xf32, #tpu.memory_space<vmem>>, %arg2: memref<8x256xf32, #tpu.memory_space<vmem>>) attributes {dimension_semantics = [#tpu.dimension_semantics<parallel>], iteration_bounds = array<i64: 1>, scalar_prefetch = 0 : i64, scratch_operands = 0 : i64, tpu.core_type = #tpu.core_type<tc>, window_params = [{transform_indices = @transform_0, window_bounds = array<i64: 8, 256>}, {transform_indices = @transform_1, window_bounds = array<i64: 8, 256>}]} {
    %c0 = arith.constant 0 : index
    %c0_0 = arith.constant 0 : index
    %0 = vector.load %arg1[%c0, %c0_0] : memref<8x256xf32, #tpu.memory_space<vmem>>, vector<8x256xf32>
    %c0_1 = arith.constant 0 : index
    %c0_2 = arith.constant 0 : index
    %1 = vector.load %arg2[%c0_1, %c0_2] : memref<8x256xf32, #tpu.memory_space<vmem>>, vector<8x256xf32>
    tpu.vector_store %arg2[%c0_1, %c0_2], %0 {strides = array<i32>} : memref<8x256xf32, #tpu.memory_space<vmem>>, vector<8x256xf32>,
    return
  }
  func.func @transform_0(%arg0: i32) -> (i32, i32) {
    %c0_i32 = arith.constant 0 : i32
    %c0_i32_0 = arith.constant 0 : i32
    return %arg0, %c0_i32 : i32, i32
  }
  func.func @transform_1(%arg0: i32) -> (i32, i32) {
    %c0_i32 = arith.constant 0 : i32
    %c0_i32_0 = arith.constant 0 : i32
    return %arg0, %c0_i32 : i32, i32
  }
}

</mosaic_0001>

<bundles_post_ra>
// kernel: tpu_custom_call.1
= control target key start
LH: loop header
LB: loop body
LE: loop exit
PB: predicated region body
PF: predicated region fallthrough
CT: control target
= control target key end

     0   :  { %6 = vsyncpa [#allocation3], 0  ;;  %s116_s0 = inlined_call_operand.hbm [shape: f32[8,256], index: 0, kind: input, shape index: {}]   ;;  %s117_s1 = inlined_call_operand.hbm [shape: f32[8,256], index: 1, kind: output, shape index: {}]  }
   0x1   :  { %7 = vsyncpa [#allocation4], 0  ;;  %s13_s8 = sshll.u32 %s116_s0, 4  ;;  %s98_s9 = smov [#allocation2]   ;;  %s14_s8 = int_to_ptr.hbm [resolvable:$true] %s13_s8 }
   0x2   :  { %s15_s10 = sshll.u32 %s98_s9, 4  ;;  %s16_s10 = int_to_ptr.vmem [resolvable:$true] %s15_s10 }
   0x3   :  { %18 = dma.hbm_to_vmem [thread:$0]  %s14_s8, 256, %s16_s10, [#allocation3]  }
   0x4   :  { %94 = dma.done.wait [#allocation3], 256  }
   0x5   :  { %95 = vsyncadd [#allocation3], 4294967040  ;;  %s99_s11 = smov [#allocation5]   ;;  %s34_s15 = sshll.u32 %s117_s1, 4  ;;  %v23_v0 = vld [vmem:[#allocation2] sm:$0xff]  ;;  %v24_v1 = vld [vmem:[#allocation2 + $0x8] sm:$0xff]  ;;  %s35_s15 = int_to_ptr.hbm [resolvable:$true] %s34_s15 }
   0x6   :  { %s32_s12 = sshll.u32 %s99_s11, 4  ;;  %25 = vst [vmem:[#allocation5] sm:$0xff] %v23_v0  ;;  %s33_s12 = int_to_ptr.vmem [resolvable:$true] %s32_s12 }
   0x7   :  { %26 = vst [vmem:[#allocation5 + $0x8] sm:$0xff] %v24_v1 }
   0x8   :  { %37 = dma.vmem_to_hbm [thread:$0]  %s33_s12, 256, %s35_s15, [#allocation4]  }
   0x9   :  { %96 = dma.done.wait [#allocation4], 256  }
   0xa   :  { %97 = vsyncadd [#allocation4], 4294967040 }
   0xb   :  { %42 = vsyncpa [#allocation3], 1 }
   0xc   :  { %43 = vsyncpa [#allocation4], 1 }

</bundles_post_ra>
